<compile_context>
chip_gen: v5e
topology: v5e:2x2
jax: 0.10.0
libtpu: 0.0.40
codegen_flags: <defaults>
</compile_context>

<pallas_src>
import jax
import jax.numpy as jnp
from jax.experimental import pallas as pl
from jax.experimental.pallas import tpu as pltpu

BN_EPS = 1e-5


def _round_up(x, m):
    return ((x + m - 1) // m) * m


def _cdiv(a, b):
    return (a + b - 1) // b


def _chip_defaults():
    """Best-effort chip introspection (safe fallbacks if anything fails)."""
    kind = ""
    try:
        kind = jax.devices()[0].device_kind.lower()
    except Exception:
        pass
    is_v5e = ("v5e" in kind) or ("v5 lite" in kind) or ("v5litepod" in kind)
    # v4 / v5p (megacore) and v7x expose 2 TensorCores per device.
    num_tc = 2 if (("v7" in kind) or ("v4" in kind) or ("v5p" in kind)) else 1
    try:
        vmem_cap = int(getattr(pltpu.get_tpu_info(), "vmem_capacity_bytes"))
    except Exception:
        vmem_cap = 64 * 1024 * 1024  # conservative (v7x per-TC size)
    return is_v5e, num_tc, vmem_cap


def classblock_kernel(x_ref, w1_ref, w2_ref, bo_ref, o_ref, h_ref):
    # grid = (batch tiles, class tiles); the class axis iterates fastest.
    # --- add_block: Linear(input_dim -> num_bottleneck); eval-mode
    #     BatchNorm1d scale is folded into w1 by the wrapper, its bias term
    #     is folded through w2 into bo. relu=False -> no LeakyReLU;
    #     droprate>0 -> Dropout is identity at inference time.
    @pl.when(pl.program_id(1) == 0)
    def _():
        h_ref[...] = jnp.dot(
            x_ref[...], w1_ref[...],
            preferred_element_type=jnp.float32).astype(h_ref.dtype)

    # --- classifier: Linear(num_bottleneck -> class tile) ---
    o_ref[...] = (jnp.dot(h_ref[...], w2_ref[...],
                          preferred_element_type=jnp.float32)
                  + bo_ref[...]).astype(o_ref.dtype)


def class_block_forward(x, params, *, batch_tile=None, n_tile=2048,
                        param_dtype=jnp.bfloat16, out_dtype=jnp.float32):
    """x: (B, input_dim). Returns (B, class_num) in out_dtype.

    batch_tile:  max rows per grid step (default: 128 on v5e, 256 otherwise).
    n_tile:      max class columns per grid step (multiple of 128).
    param_dtype: matmul dtype for weights AND activations (bf16 recommended
                 for inference; accumulation stays float32).
    """
    w1, b1, gamma, beta, run_mean, run_var, w2, b2 = params
    B, D = x.shape
    NB = w1.shape[1]
    C = w2.shape[1]

    is_v5e, num_tc, vmem_cap = _chip_defaults()
    if batch_tile is None:
        batch_tile = 128 if is_v5e else 256

    # ---- Fold eval-mode BatchNorm into the first Linear (exact) -----------
    #   y = ((x@w1 + b1) - mean) * gamma/sqrt(var+eps) + beta
    #     = x @ (w1*s) + ((b1-mean)*s + beta),   s = gamma * rsqrt(var+eps)
    scale = gamma * jax.lax.rsqrt(run_var + BN_EPS)                 # (NB,)
    w1f = (w1 * scale[None, :]).astype(param_dtype)                 # (D, NB)
    b1f = (b1 - run_mean) * scale + beta                            # (NB,) f32

    # ---- Fold b1f through the classifier (relu=False, dropout=identity):
    #   (h + b1f) @ w2 + b2 == h @ w2 + (b1f @ w2 + b2)
    b_out = b1f @ w2 + b2                                           # (C,) f32
    # TODO(synk): for tiny class heads (D*Cp <= D*NB + NB*Cp) the whole block
    # could be collapsed to a single x @ (W1f@W2) + b_out matmul.

    # ---- Tile & pad class_num to lane-dense multiples of 128 ---------------
    TN = _round_up(min(n_tile, _round_up(C, 128)), 128)
    Cp = _round_up(C, TN)
    n_n = Cp // TN
    w2p = jnp.pad(w2, ((0, 0), (0, Cp - C))).astype(param_dtype)
    bor = jnp.pad(b_out, (0, Cp - C)).astype(jnp.float32).reshape(1, Cp)

    # ---- Batch tiling: MXU-friendly tile, cdiv grid, pad the batch ---------
    TB = _round_up(min(batch_tile, _round_up(B, 8)), 8)
    if num_tc >= 2 and B >= 128 and _cdiv(B, TB) * n_n < num_tc:
        # Make sure both TensorCores get work on megacore / v7x chips.
        TB = _round_up(_cdiv(_round_up(B, 8), num_tc), 8)
    n_m = _cdiv(B, TB)
    B_pad = n_m * TB
    xp = x if B_pad == B else jnp.pad(x, ((0, B_pad - B), (0, 0)))
    xp = xp.astype(param_dtype)     # bf16 activations -> native MXU rate

    # ---- Operand specs: single-buffer anything grid-invariant --------------
    w1_spec = pl.BlockSpec((D, NB), lambda i, j: (0, 0),
                           pipeline_mode=pl.Buffered(1))
    if n_n == 1:    # whole class head in one tile -> also grid-invariant
        w2_spec = pl.BlockSpec((NB, TN), lambda i, j: (0, j),
                               pipeline_mode=pl.Buffered(1))
        bo_spec = pl.BlockSpec((1, TN), lambda i, j: (0, j),
                               pipeline_mode=pl.Buffered(1))
        n_w2_buf = 1
    else:
        w2_spec = pl.BlockSpec((NB, TN), lambda i, j: (0, j))
        bo_spec = pl.BlockSpec((1, TN), lambda i, j: (0, j))
        n_w2_buf = 2

    # ---- VMEM budget (~85% of physical; no artificial 64 MiB cap) ----------
    p_isz = jnp.dtype(param_dtype).itemsize
    o_isz = jnp.dtype(out_dtype).itemsize
    est = (2 * TB * D * p_isz             # x tile (double-buffered)
           + 1 * D * NB * p_isz           # w1 (Buffered(1))
           + n_w2_buf * NB * TN * p_isz   # w2 tile
           + n_w2_buf * 8 * TN * 4        # bias row (8-sublane padded)
           + 2 * TB * TN * o_isz          # output tile
           + TB * NB * p_isz)             # h scratch
    vmem_limit = int(min(max(2 * est, 16 * 1024 * 1024),
                         int(0.85 * vmem_cap)))

    # TODO(synk): for very large input_dim (>= ~8192 in bf16) add a trailing
    # "arbitrary" K grid axis streaming w1 in (TK, NB) chunks into an f32
    # accumulator; unnecessary for typical ClassBlock dims (input_dim ~ 2048).
    # TODO(synk): training-mode Dropout / batch-statistics BN and the
    # return_f=True (feature, logits) tuple output are not implemented.

    out = pl.pallas_call(
        classblock_kernel,
        out_shape=jax.ShapeDtypeStruct((B_pad, Cp), out_dtype),
        grid_spec=pltpu.PrefetchScalarGridSpec(
            num_scalar_prefetch=0,
            grid=(n_m, n_n),
            in_specs=[
                pl.BlockSpec((TB, D), lambda i, j: (i, 0)),   # x tile
                w1_spec,                                       # w1 (BN folded)
                w2_spec,                                       # w2 class tile
                bo_spec,                                       # fused bias tile
            ],
            out_specs=pl.BlockSpec((TB, TN), lambda i, j: (i, j)),
            scratch_shapes=[pltpu.VMEM((TB, NB), param_dtype)],  # bottleneck h
        ),
        compiler_params=pltpu.CompilerParams(
            dimension_semantics=("parallel", "arbitrary"),
            vmem_limit_bytes=vmem_limit,
        ),
    )(xp, w1f, w2p, bor)

    return out[:B, :C]


def init_params(key, input_dim, num_bottleneck, class_num):
    """Synthetic params mirroring the PyTorch init functions.  Running stats
    are perturbed (as they would be after training) so the BN fold and the
    bias fold are actually exercised by the tests."""
    k1, k2, k3, k4, k5 = jax.random.split(key, 5)
    # Linear1: kaiming_normal_(mode='fan_out') -> std = sqrt(2 / fan_out)
    std1 = (2.0 / num_bottleneck) ** 0.5
    w1 = (jax.random.normal(k1, (num_bottleneck, input_dim),
                            jnp.float32) * std1).T            # (in, out)
    b1 = jnp.zeros((num_bottleneck,), jnp.float32)
    # BatchNorm1d: weight ~ N(1, 0.02), bias = 0, non-trivial running stats
    gamma = 1.0 + 0.02 * jax.random.normal(k2, (num_bottleneck,), jnp.float32)
    beta = jnp.zeros((num_bottleneck,), jnp.float32)
    run_mean = 0.1 * jax.random.normal(k4, (num_bottleneck,), jnp.float32)
    run_var = jax.random.uniform(k5, (num_bottleneck,), jnp.float32,
                                 minval=0.5, maxval=1.5)
    # classifier Linear: weight ~ N(0, 0.001), bias = 0
    w2 = (0.001 * jax.random.normal(k3, (class_num, num_bottleneck),
                                    jnp.float32)).T            # (in, out)
    b2 = jnp.zeros((class_num,), jnp.float32)
    return (w1, b1, gamma, beta, run_mean, run_var, w2, b2)


def reference_forward(x, params):
    w1, b1, gamma, beta, run_mean, run_var, w2, b2 = params
    h = x @ w1 + b1
    h = (h - run_mean) / jnp.sqrt(run_var + BN_EPS) * gamma + beta
    return h @ w2 + b2


if __name__ == "__main__":
    B, INPUT_DIM, NUM_BOTTLENECK, CLASS_NUM = 8, 64, 128, 32

    key = jax.random.PRNGKey(0)
    kx, kp, kx2, kp2 = jax.random.split(key, 4)
    x = jax.random.normal(kx, (B, INPUT_DIM), jnp.float32)
    params = init_params(kp, INPUT_DIM, NUM_BOTTLENECK, CLASS_NUM)
    ref = reference_forward(x, params)

    # 1) exact path: f32 weights & activations (tight tolerance)
    out_f32 = jax.block_until_ready(
        class_block_forward(x, params, param_dtype=jnp.float32))
    assert out_f32.shape == (B, CLASS_NUM)
    assert jnp.allclose(out_f32, ref, atol=1e-4, rtol=1e-4), "f32 mismatch"

    # 2) default bf16 fast path (+ bf16 output); looser tolerance since the
    #    weights, activations and the bottleneck intermediate are bf16.
    out_bf16 = jax.block_until_ready(
        class_block_forward(x, params, out_dtype=jnp.bfloat16))
    assert out_bf16.shape == (B, CLASS_NUM)
    assert jnp.allclose(out_bf16.astype(jnp.float32), ref,
                        atol=2e-3, rtol=5e-2), "bf16 mismatch"

    # 3) non-divisible batch + multi-N-tile path (class head tiled over Cp).
    B2, C2 = 10, 200
    x2 = jax.random.normal(kx2, (B2, INPUT_DIM), jnp.float32)
    params2 = init_params(kp2, INPUT_DIM, NUM_BOTTLENECK, C2)
    ref2 = reference_forward(x2, params2)
    out2 = jax.block_until_ready(
        class_block_forward(x2, params2, param_dtype=jnp.float32, n_tile=128))
    assert out2.shape == (B2, C2)
    assert jnp.allclose(out2, ref2, atol=1e-4, rtol=1e-4), \
        "mismatch (padded batch / tiled class head)"

    print("KERNEL_OK")
</pallas_src>

<mosaic_0001>
module attributes {stable_mosaic.version = 11 : i64} {
  func.func @classblock_kernel(%arg0: i32, %arg1: i32, %arg2: memref<8x64xf32, #tpu.memory_space<vmem>>, %arg3: memref<64x128xf32, #tpu.memory_space<vmem>>, %arg4: memref<128x128xf32, #tpu.memory_space<vmem>>, %arg5: memref<1x128xf32, #tpu.memory_space<vmem>>, %arg6: memref<8x128xf32, #tpu.memory_space<vmem>>, %arg7: memref<8x128xf32, #tpu.memory_space<vmem>>) attributes {dimension_semantics = [#tpu.dimension_semantics<parallel>, #tpu.dimension_semantics<arbitrary>], iteration_bounds = array<i64: 1, 1>, scalar_prefetch = 0 : i64, scratch_operands = 1 : i64, tpu.core_type = #tpu.core_type<tc>, window_params = [{transform_indices = @transform_0, window_bounds = array<i64: 8, 64>}, {pipeline_mode = #tpu.pipeline_mode<synchronous>, transform_indices = @transform_1, window_bounds = array<i64: 64, 128>}, {pipeline_mode = #tpu.pipeline_mode<synchronous>, transform_indices = @transform_2, window_bounds = array<i64: 128, 128>}, {pipeline_mode = #tpu.pipeline_mode<synchronous>, transform_indices = @transform_3, window_bounds = array<i64: 1, 128>}, {transform_indices = @transform_4, window_bounds = array<i64: 8, 128>}]} {
    %c0_i32 = arith.constant 0 : i32
    %0 = arith.cmpi eq, %arg1, %c0_i32 : i32
    %1 = arith.extui %0 : i1 to i32
    %c0_i32_0 = arith.constant 0 : i32
    %2 = arith.cmpi ne, %1, %c0_i32_0 : i32
    scf.if %2 {
      %c0_8 = arith.constant 0 : index
      %c0_9 = arith.constant 0 : index
      %10 = vector.load %arg2[%c0_8, %c0_9] : memref<8x64xf32, #tpu.memory_space<vmem>>, vector<8x64xf32>
      %c0_10 = arith.constant 0 : index
      %c0_11 = arith.constant 0 : index
      %11 = vector.load %arg3[%c0_10, %c0_11] : memref<64x128xf32, #tpu.memory_space<vmem>>, vector<64x128xf32>
      %cst_12 = arith.constant dense<0.000000e+00> : vector<8x128xf32>
      %12 = tpu.matmul %10, %11, %cst_12 {dimension_numbers = #tpu.dot_dimension_numbers<[1], [0], [0], [1], [0, 0, 1, 1], [], []>} : vector<8x64xf32>, vector<64x128xf32>, vector<8x128xf32> -> vector<8x128xf32>
      %c0_13 = arith.constant 0 : index
      %c0_14 = arith.constant 0 : index
      %13 = vector.load %arg7[%c0_13, %c0_14] : memref<8x128xf32, #tpu.memory_space<vmem>>, vector<8x128xf32>
      tpu.vector_store %arg7[%c0_13, %c0_14], %12 {strides = array<i32>} : memref<8x128xf32, #tpu.memory_space<vmem>>, vector<8x128xf32>,
    } else {
    }
    %c0 = arith.constant 0 : index
    %c0_1 = arith.constant 0 : index
    %3 = vector.load %arg7[%c0, %c0_1] : memref<8x128xf32, #tpu.memory_space<vmem>>, vector<8x128xf32>
    %c0_2 = arith.constant 0 : index
    %c0_3 = arith.constant 0 : index
    %4 = vector.load %arg4[%c0_2, %c0_3] : memref<128x128xf32, #tpu.memory_space<vmem>>, vector<128x128xf32>
    %cst = arith.constant dense<0.000000e+00> : vector<8x128xf32>
    %5 = tpu.matmul %3, %4, %cst {dimension_numbers = #tpu.dot_dimension_numbers<[1], [0], [0], [1], [0, 0, 1, 1], [], []>} : vector<8x128xf32>, vector<128x128xf32>, vector<8x128xf32> -> vector<8x128xf32>
    %c0_4 = arith.constant 0 : index
    %c0_5 = arith.constant 0 : index
    %6 = vector.load %arg5[%c0_4, %c0_5] : memref<1x128xf32, #tpu.memory_space<vmem>>, vector<1x128xf32>
    %7 = vector.broadcast %6 : vector<1x128xf32> to vector<8x128xf32>
    %8 = arith.addf %5, %7 : vector<8x128xf32>
    %c0_6 = arith.constant 0 : index
    %c0_7 = arith.constant 0 : index
    %9 = vector.load %arg6[%c0_6, %c0_7] : memref<8x128xf32, #tpu.memory_space<vmem>>, vector<8x128xf32>
    tpu.vector_store %arg6[%c0_6, %c0_7], %8 {strides = array<i32>} : memref<8x128xf32, #tpu.memory_space<vmem>>, vector<8x128xf32>,
    return
  }
  func.func @transform_0(%arg0: i32, %arg1: i32) -> (i32, i32) {
    %c0_i32 = arith.constant 0 : i32
    %c0_i32_0 = arith.constant 0 : i32
    return %arg0, %c0_i32 : i32, i32
  }
  func.func @transform_1(%arg0: i32, %arg1: i32) -> (i32, i32) {
    %c0_i32 = arith.constant 0 : i32
    %c0_i32_0 = arith.constant 0 : i32
    %c0_i32_1 = arith.constant 0 : i32
    return %c0_i32, %c0_i32_0 : i32, i32
  }
  func.func @transform_2(%arg0: i32, %arg1: i32) -> (i32, i32) {
    %c0_i32 = arith.constant 0 : i32
    %c0_i32_0 = arith.constant 0 : i32
    return %c0_i32, %arg1 : i32, i32
  }
  func.func @transform_3(%arg0: i32, %arg1: i32) -> (i32, i32) {
    %c0_i32 = arith.constant 0 : i32
    %c0_i32_0 = arith.constant 0 : i32
    return %c0_i32, %arg1 : i32, i32
  }
  func.func @transform_4(%arg0: i32, %arg1: i32) -> (i32, i32) {
    %c0_i32 = arith.constant 0 : i32
    return %arg0, %arg1 : i32, i32
  }
}

</mosaic_0001>

<bundles_post_ra>
// kernel: tpu_custom_call.1
= control target key start
LH: loop header
LB: loop body
LE: loop exit
PB: predicated region body
PF: predicated region fallthrough
CT: control target
= control target key end

     0   :  { %9 = vsyncpa [#allocation4], 0  ;;  %s317_s0 = inlined_call_operand.hbm [shape: f32[8,64], index: 0, kind: input, shape index: {}]   ;;  %s318_s1 = inlined_call_operand.hbm [shape: f32[64,128], index: 1, kind: input, shape index: {}]   ;;  %s319_s2 = inlined_call_operand.hbm [shape: f32[128,128], index: 2, kind: input, shape index: {}]   ;;  %s320_s3 = inlined_call_operand.vmem [shape: f32[1,128], index: 3, kind: input, shape index: {}]   ;;  %s321_s4 = inlined_call_operand.hbm [shape: f32[8,128], index: 4, kind: output, shape index: {}]  }
   0x1   :  { %10 = vsyncpa [#allocation7], 0  ;;  %s27_s17 = sshll.u32 %s318_s1, 4  ;;  %s28_s17 = int_to_ptr.hbm [resolvable:$true] %s27_s17 }
   0x2   :  { %11 = vsyncpa [#allocation5], 0  ;;  %s271_s18 = smov [#allocation6]   ;;  %s17_s22 = sshll.u32 %s317_s0, 4  ;;  %s18_s22 = int_to_ptr.hbm [resolvable:$true] %s17_s22 }
   0x3   :  { %s29_s19 = sshll.u32 %s271_s18, 4  ;;  %s272_s23 = smov 128   ;;  %s30_s19 = int_to_ptr.vmem [resolvable:$true] %s29_s19 }
   0x4   :  { %s273_s24 = smov 8   ;;  %s274_s25 = smov [#allocation3]  }
   0x5   :  { %35 = dma.hbm_to_vmem [thread:$0]  %s28_s17, 1024, %s30_s19, [#allocation7], %s272_s23, %s272_s23, %s273_s24  }
   0x6   :  { %s19_s26 = sshll.u32 %s274_s25, 4  ;;  %s40_s29 = sshll.u32 %s319_s2, 4  ;;  %s20_s26 = int_to_ptr.vmem [resolvable:$true] %s19_s26  ;;  %s41_s29 = int_to_ptr.hbm [resolvable:$true] %s40_s29 }
   0x7   :  { %22 = dma.hbm_to_vmem [thread:$0]  %s18_s22, 128, %s20_s26, [#allocation4]  }
   0x8   :  { %s275_s1 = smov [#allocation8]  }
   0x9   :  { %s42_s30 = sshll.u32 %s275_s1, 4  ;;  %s43_s30 = int_to_ptr.vmem [resolvable:$true] %s42_s30 }
   0xa   :  { %48 = dma.hbm_to_vmem [thread:$0]  %s41_s29, 2048, %s43_s30, [#allocation7], %s272_s23, %s272_s23, %s273_s24  }
   0xb   :  { %265 = dma.done.wait [#allocation4], 128  }
   0xc   :  { %266 = vsyncadd [#allocation4], 4294967168 }
   0xd   :  { %267 = dma.done.wait [#allocation7], 3072  }
   0xe   :  { %268 = vsyncadd [#allocation7], 4294964224  ;;  %v75_v0 = vld [vmem:[#allocation6 + $0x38] sm:$0xff]  ;;  %v74_v1 = vld [vmem:[#allocation6 + $0x30] sm:$0xff]  ;;  %vm76_vm0 = vcmask 523264   ;;  %s276_s5 = smov [#allocation9]  }
   0xf   :  { %88 = vmatpush.msra.mxu0 %v75_v0  ;;  %v73_v2 = vld [vmem:[#allocation6 + $0x28] sm:$0xff]  ;;  %v117_v3 = vld [vmem:[#allocation8 + $0x78] sm:$0xff]  ;;  %v116_v4 = vld [vmem:[#allocation8 + $0x70] sm:$0xff]  ;;  %s148_s6 = sshll.u32 %s276_s5, 4  ;;  %s150_s9 = sshll.u32 %s321_s4, 4  ;;  %s149_s6 = int_to_ptr.vmem [resolvable:$true] %s148_s6  ;;  %s151_s9 = int_to_ptr.hbm [resolvable:$true] %s150_s9 }
  0x10   :  { %v72_v5 = vld [vmem:[#allocation6 + $0x20] sm:$0xff]  ;;  %122 = vmatpush.msra.mxu1 %v117_v3  ;;  %v115_v6 = vld [vmem:[#allocation8 + $0x68] sm:$0xff]  ;;  %v71_v7 = vld [vmem:[#allocation6 + $0x18] sm:$0xff] }
  0x11   :  { %89 = vmatpush.msra.mxu0 %v74_v1  ;;  %v114_v8 = vld [vmem:[#allocation8 + $0x60] sm:$0xff]  ;;  %v70_v9 = vld [vmem:[#allocation6 + $0x10] sm:$0xff]  ;;  %v113_v10 = vld [vmem:[#allocation8 + $0x58] sm:$0xff] }
  0x12   :  { %123 = vmatpush.msra.mxu1 %v116_v4  ;;  %v69_v11 = vld [vmem:[#allocation6 + $0x8] sm:$0xff]  ;;  %v112_v12 = vld [vmem:[#allocation8 + $0x50] sm:$0xff]  ;;  %v68_v13 = vld [vmem:[#allocation6] sm:$0xff] }
  0x13   :  { %90 = vmatpush.msra.mxu0 %v73_v2  ;;  %v67_v14 = vld [vmem:[#allocation3] sm:$0xff]  ;;  %v111_v15 = vld [vmem:[#allocation8 + $0x48] sm:$0xff]  ;;  %v110_v16 = vld [vmem:[#allocation8 + $0x40] sm:$0xff] }
  0x14   :  { %124 = vmatpush.msra.mxu1 %v115_v6  ;;  %v109_v17 = vld [vmem:[#allocation8 + $0x38] sm:$0xff]  ;;  %v108_v18 = vld [vmem:[#allocation8 + $0x30] sm:$0xff]  ;;  %v107_v19 = vld [vmem:[#allocation8 + $0x28] sm:$0xff] }
  0x15   :  { %91 = vmatpush.msra.mxu0 %v72_v5  ;;  %v106_v20 = vld [vmem:[#allocation8 + $0x20] sm:$0xff]  ;;  %v105_v21 = vld [vmem:[#allocation8 + $0x18] sm:$0xff]  ;;  %v104_v22 = vld [vmem:[#allocation8 + $0x10] sm:$0xff] }
  0x16   :  { %125 = vmatpush.msra.mxu1 %v114_v8  ;;  %v103_v23 = vld [vmem:[#allocation8 + $0x8] sm:$0xff]  ;;  %v102_v24 = vld [vmem:[#allocation8] sm:$0xff]  ;;  %v168_v26 = vld [vmem:[%s320_s3] ss:$0 sm:$0xff] }
  0x17   :  { %92 = vmatpush.msra.mxu0 %v71_v7 }
  0x18   :  { %126 = vmatpush.msra.mxu1 %v113_v10 }
  0x19   :  { %93 = vmatpush.msra.mxu0 %v70_v9 }
  0x1a   :  { %127 = vmatpush.msra.mxu1 %v112_v12 }
  0x1b   :  { %94 = vmatpush.msra.mxu0 %v69_v11 }
  0x1c   :  { %128 = vmatpush.msra.mxu1 %v111_v15 }
  0x1d   :  { %95 = vmatpush.msra.mxu0 %v68_v13 }
  0x1e   :  { %161 = vmatmul.msk.f32.vlgmr.msra.gmra.mxu0 %vm76_vm0, %v67_v14  ;;  %129 = vmatpush.msra.mxu1 %v110_v16 }
  0x20   :  { %130 = vmatpush.msra.mxu1 %v109_v17 }
  0x22   :  { %131 = vmatpush.msra.mxu1 %v108_v18 }
  0x24   :  { %132 = vmatpush.msra.mxu1 %v107_v19 }
  0x26   :  { %133 = vmatpush.msra.mxu1 %v106_v20 }
  0x28   :  { %134 = vmatpush.msra.mxu1 %v105_v21 }
  0x2a   :  { %135 = vmatpush.msra.mxu1 %v104_v22 }
  0x2c   :  { %136 = vmatpush.msra.mxu1 %v103_v23 }
  0x2e   :  { %137 = vmatpush.msra.mxu1 %v102_v24 }
  0x9b   :  { %v97_v25 = vpop.f32.mrf.mxu0 }
  0x9c   :  { %138 = vmatmul.f32.vlgmr.msra.gmra.mxu1 %v97_v25 }
 0x119   :  { %v139_v27 = vpop.f32.mrf.mxu1 }
 0x11a   :  { %v140_v28 = vadd.f32 %v168_v26, %v139_v27 }
 0x11c   :  { %142 = vst [vmem:[#allocation9] sm:$0xff] %v140_v28 }
 0x11d   :  { %153 = dma.vmem_to_hbm [thread:$0]  %s149_s6, 128, %s151_s9, [#allocation5]  }
 0x11e   :  { %269 = dma.done.wait [#allocation5], 128  }
 0x11f   :  { %270 = vsyncadd [#allocation5], 4294967168 }
 0x120   :  { %158 = vsyncpa [#allocation4], 1 }
 0x121   :  { %159 = vsyncpa [#allocation7], 1 }
 0x122   :  { %160 = vsyncpa [#allocation5], 1 }

</bundles_post_ra>
